<compile_context>
chip_gen: v7x
topology: tpu7x:2x2x1
jax: 0.10.0
libtpu: 0.0.40
codegen_flags: <defaults>
</compile_context>

<pallas_src>
import functools

import numpy as np
import jax
import jax.numpy as jnp
from jax.experimental import pallas as pl
from jax.experimental.pallas import tpu as pltpu


_PPM_KERNEL_SIZES = (1, 3, 5)


# --------------------------------------------------------------------------
# pltpu.roll rotation-direction probe (memoized: runs at most once per process)
# --------------------------------------------------------------------------

@functools.lru_cache(maxsize=None)
def roll_matches_numpy_convention():
    """Pin down pltpu.roll's rotation direction with a one-shot probe kernel.

    The 3x3-conv shifts below are baked in as static Python ints, so a silent
    rotation-convention difference would corrupt results with no trace-time
    error; this tiny (cached) probe makes the shift sign robust.
    """
    n = 128
    x = jnp.broadcast_to(jnp.arange(n, dtype=jnp.int32), (8, n))

    def probe(x_ref, o_ref):
        o_ref[...] = pltpu.roll(x_ref[...], 1, 1)

    y = pl.pallas_call(probe, out_shape=jax.ShapeDtypeStruct((8, n), jnp.int32))(x)
    v = int(jax.device_get(y)[0, 0])
    if v == n - 1:
        return True      # roll(x, s)[i] == x[(i - s) % n]   (numpy convention)
    if v == 1:
        return False     # roll(x, s)[i] == x[(i + s) % n]
    raise RuntimeError(f"unexpected pltpu.roll semantics (probe saw {v})")


# --------------------------------------------------------------------------
# Host-side linear operators (adaptive avg-pool / bilinear upsample) & packing
# --------------------------------------------------------------------------

def _adaptive_pool_matrix_1d(n, k):
    """P s.t. P @ v == AdaptiveAvgPool1d(k)(v) (PyTorch bin boundaries)."""
    P = np.zeros((k, n), np.float64)
    for i in range(k):
        s = (i * n) // k
        e = -((-(i + 1) * n) // k)       # ceil((i+1)*n/k)
        P[i, s:e] = 1.0 / (e - s)
    return P


def _upsample_matrix_1d(k, n):
    """U s.t. U @ v == linear interpolation k -> n with align_corners=True."""
    U = np.zeros((n, k), np.float64)
    if k == 1:
        U[:, 0] = 1.0
        return U
    scale = (k - 1) / (n - 1)
    for y in range(n):
        src = y * scale
        i0 = min(int(np.floor(src)), k - 2)
        f = src - i0
        U[y, i0] = 1.0 - f
        U[y, i0 + 1] = f
    return U


def build_constants(H, W, C, w1x1, wcat, compute_dtype=jnp.bfloat16):
    """Pack all grid-invariant operands consumed by the fused kernel."""
    HW = H * W
    seg = [((k * k + 7) // 8) * 8 for k in _PPM_KERNEL_SIZES]     # 8, 16, 32
    off = np.concatenate([[0], np.cumsum(seg)])                   # 0, 8, 24, 56
    K2P = int(-(-int(off[-1]) // 64) * 64)                        # pad 56 -> 64

    Pstack = np.zeros((K2P, HW), np.float64)    # stacked adaptive-avg-pool maps
    Ustack = np.zeros((HW, K2P), np.float64)    # stacked bilinear upsample maps
    bmask = np.zeros((3 * C, K2P), np.float32)  # block-diag branch selector
    for b, k in enumerate(_PPM_KERNEL_SIZES):
        Pstack[off[b]:off[b] + k * k, :] = np.kron(
            _adaptive_pool_matrix_1d(H, k), _adaptive_pool_matrix_1d(W, k))
        Ustack[:, off[b]:off[b] + k * k] = np.kron(
            _upsample_matrix_1d(k, H), _upsample_matrix_1d(k, W))
        bmask[b * C:(b + 1) * C, off[b]:off[b + 1]] = 1.0

    # 3x3 conv taps flattened along the contraction axis (dy-major tap order;
    # must match the shift order in the kernel): (C, 9*4C).
    wcat_np = np.asarray(wcat)
    wc_flat = np.concatenate([wcat_np[:, :, dy, dx]
                              for dy in range(3) for dx in range(3)], axis=1)

    # Per-tap spatial validity masks (zero where the padded 3x3 source is OOB),
    # stored compactly as (9, HW); broadcast over channels inside the kernel.
    hh, ww = np.meshgrid(np.arange(H), np.arange(W), indexing="ij")
    cmask = np.zeros((9, HW), np.float32)
    for j, (dy, dx) in enumerate((dy, dx) for dy in range(3) for dx in range(3)):
        valid = ((hh + dy - 1 >= 0) & (hh + dy - 1 < H)
                 & (ww + dx - 1 >= 0) & (ww + dx - 1 < W))
        cmask[j, :] = valid.reshape(-1)

    w1stack = np.concatenate([np.asarray(w).reshape(C, C) for w in w1x1], axis=0)
    return (
        jnp.asarray(Pstack.T, compute_dtype),   # (HW, K2P)   pool map (transposed)
        jnp.asarray(w1stack, compute_dtype),    # (3C, C)     stacked 1x1 convs
        jnp.asarray(bmask, jnp.float32),        # (3C, K2P)   branch block-diag mask
        jnp.asarray(Ustack.T, compute_dtype),   # (K2P, HW)   upsample map (transposed)
        jnp.asarray(wc_flat, compute_dtype),    # (C, 9*4C)   flattened 3x3 conv taps
        jnp.asarray(cmask, compute_dtype),      # (9, HW)     tap validity masks
    )


# --------------------------------------------------------------------------
# Fused Pallas kernel
# --------------------------------------------------------------------------

def make_ppm_forward(H, W, C, *, bt=None, roll_is_numpy=None,
                     compute_dtype=jnp.bfloat16, out_dtype=jnp.float32):
    """Builds the fused PPM forward. `bt` = images per grid step (None = auto:
    keep 2 grid steps so both v7x TensorCores stay busy; set bt=B on v5e/v6e to
    collapse to a single fat step)."""
    if roll_is_numpy is None:
        roll_is_numpy = roll_matches_numpy_convention()

    HW = H * W
    C3, C4 = 3 * C, 4 * C
    assert C % 8 == 0, "C must be a multiple of 8 (sublane tile / slice alignment)"
    assert HW % 128 == 0, "H*W must be a multiple of 128 (lane-dense layout)"

    # Static lane shifts for the 9 conv taps (dy-major, same order as wc/cmask).
    # Flattened source offset for output position p is p + (dy-1)*W + (dx-1).
    tap_shifts = []
    for dy in range(3):
        for dx in range(3):
            offset = (dy - 1) * W + (dx - 1)
            tap_shifts.append(((-offset) if roll_is_numpy else offset) % HW)

    def make_kernel(Bt):
        def kernel(x_ref, pT_ref, w1_ref, bm_ref, uT_ref, wc_ref, cm_ref, o_ref):
            x = x_ref[...]                                        # (Bt*C, HW) f32
            # All 3 adaptive-avg-pools for all Bt images: one GEMM, batch on M.
            pooled = jnp.dot(x.astype(compute_dtype), pT_ref[...],
                             preferred_element_type=jnp.float32)  # (Bt*C, K2P)
            w1 = w1_ref[...]                                      # (3C, C)
            bm = bm_ref[...]                                      # (3C, K2P) f32
            uT = uT_ref[...]                                      # (K2P, HW)
            wc = wc_ref[...]                                      # (C, 9*4C)

            for b in range(Bt):                                   # static unroll
                pooled_b = pooled[b * C:(b + 1) * C, :]           # (C, K2P)
                # Stacked 1x1 convs + ReLU; bmask keeps only the block-diagonal
                # (branch-row-block, branch-column-segment) terms.
                act = jnp.maximum(
                    jnp.dot(w1, pooled_b.astype(compute_dtype),
                            preferred_element_type=jnp.float32), 0.0)
                act = (act * bm).astype(compute_dtype)            # (3C, K2P)
                up = jnp.dot(act, uT,
                             preferred_element_type=jnp.float32)  # (3C, HW) f32

                # cat = [x_b ; up_k1 ; up_k3 ; up_k5]; registers only, cast ONCE.
                cat = jnp.concatenate(
                    [x[b * C:(b + 1) * C, :], up], axis=0).astype(compute_dtype)

                # ppms_cat 3x3 conv (pad=1, bias-free) as ONE fused GEMM:
                # pre-masked rolled copies stacked along the contraction axis.
                parts = []
                for j, shift in enumerate(tap_shifts):
                    t = cat if shift == 0 else pltpu.roll(cat, shift, 1)
                    parts.append(t * cm_ref[j:j + 1, :])          # (4C, HW) bf16
                stack = jnp.concatenate(parts, axis=0)            # (9*4C, HW)
                out_b = jnp.dot(wc, stack,
                                preferred_element_type=jnp.float32)  # (C, HW)
                o_ref[b * C:(b + 1) * C, :] = jnp.maximum(out_b, 0.0).astype(
                    o_ref.dtype)
        return kernel

    def forward(x_nchw, consts):
        B = x_nchw.shape[0]
        pT, w1, bm, uT, wc, cm = consts
        K2P = pT.shape[1]
        # Auto batch-blocking: 2 grid steps when possible (keeps both v7x TCs
        # busy) while amortizing per-step overhead; bt=B collapses to 1 step.
        Bt = bt if bt is not None else (B // 2 if (B % 2 == 0 and B >= 2) else 1)
        assert B % Bt == 0, "batch must be divisible by images-per-step"

        xf = x_nchw.reshape(B * C, HW)          # free reshape, no transpose
        out = pl.pallas_call(
            make_kernel(Bt),
            out_shape=jax.ShapeDtypeStruct((B * C, HW), out_dtype),
            grid=(B // Bt,),
            in_specs=[
                pl.BlockSpec((Bt * C, HW), lambda i: (i, 0)),     # x (per-step)
                pl.BlockSpec((HW, K2P), lambda i: (0, 0)),        # Pstack^T
                pl.BlockSpec((C3, C), lambda i: (0, 0)),          # stacked 1x1 W
                pl.BlockSpec((C3, K2P), lambda i: (0, 0)),        # branch mask
                pl.BlockSpec((K2P, HW), lambda i: (0, 0)),        # Ustack^T
                pl.BlockSpec((C, 36 * C), lambda i: (0, 0)),      # 3x3 taps (flat)
                pl.BlockSpec((9, HW), lambda i: (0, 0)),          # tap masks
            ],
            out_specs=pl.BlockSpec((Bt * C, HW), lambda i: (i, 0)),
            compiler_params=pltpu.CompilerParams(
                dimension_semantics=("parallel",),        # megacore over batch
                vmem_limit_bytes=32 * 1024 * 1024),
        )(xf, pT, w1, bm, uT, wc, cm)
        return out.reshape(B, C, H, W)                    # free reshape
    return forward


# --------------------------------------------------------------------------
# Faithful f32 reference of the PyTorch module (for validation)
# --------------------------------------------------------------------------

def reference_forward(x_nchw, w1x1, wcat):
    B, C, H, W = x_nchw.shape
    outs = [x_nchw]
    for k, w1 in zip(_PPM_KERNEL_SIZES, w1x1):
        rows = [((i * H) // k, -((-(i + 1) * H) // k)) for i in range(k)]
        cols = [((j * W) // k, -((-(j + 1) * W) // k)) for j in range(k)]
        pooled = jnp.stack(
            [jnp.stack([x_nchw[:, :, r0:r1, c0:c1].mean(axis=(2, 3))
                        for (c0, c1) in cols], axis=-1)
             for (r0, r1) in rows], axis=-2)                        # (B, C, k, k)
        act = jnp.maximum(jnp.einsum("oc,bcij->boij", w1, pooled), 0.0)
        Uh = jnp.asarray(_upsample_matrix_1d(k, H), jnp.float32)
        Uw = jnp.asarray(_upsample_matrix_1d(k, W), jnp.float32)
        outs.append(jnp.einsum("hi,boij,wj->bohw", Uh, act, Uw))
    cat = jnp.concatenate(outs, axis=1)                             # (B, 4C, H, W)
    conv = jax.lax.conv_general_dilated(
        cat, wcat, window_strides=(1, 1), padding=((1, 1), (1, 1)),
        dimension_numbers=("NCHW", "OIHW", "NCHW"))
    return jnp.maximum(conv, 0.0)


# --------------------------------------------------------------------------

if __name__ == "__main__":
    B, C, H, W = 2, 8, 16, 16        # small PPM: in_channel = 8, 16x16 feature map
    key = jax.random.PRNGKey(0)
    kx, kw1, kw2, kw3, kwc = jax.random.split(key, 5)
    x = jax.random.normal(kx, (B, C, H, W), jnp.float32)
    # Shapes mirror the PyTorch module: three bias-free 1x1 convs (C, C) and the
    # bias-free ppms_cat conv (C, 4C, 3, 3).
    w1x1 = [jax.random.normal(kk, (C, C), jnp.float32) / np.sqrt(C)
            for kk in (kw1, kw2, kw3)]
    wcat = jax.random.normal(kwc, (C, 4 * C, 3, 3), jnp.float32) / np.sqrt(4 * C * 9)

    consts = build_constants(H, W, C, w1x1, wcat, jnp.bfloat16)
    fwd = jax.jit(make_ppm_forward(H, W, C))

    out = jax.block_until_ready(fwd(x, consts))
    ref = jax.block_until_ready(reference_forward(x, w1x1, wcat))

    assert out.shape == (B, C, H, W)
    # Kernel uses bf16 MXU operands with f32 accumulation; tolerance is sized
    # for bf16 operand quantization relative to the f32 reference.
    np.testing.assert_allclose(np.asarray(out), np.asarray(ref),
                               rtol=5e-2, atol=5e-2)
    print("KERNEL_OK")
</pallas_src>

<mosaic_0001>
module attributes {stable_mosaic.version = 11 : i64} {
  func.func @probe(%arg0: memref<8x128xi32, #tpu.memory_space<vmem>>, %arg1: memref<8x128xi32, #tpu.memory_space<vmem>>) attributes {dimension_semantics = [], scalar_prefetch = 0 : i64, scratch_operands = 0 : i64, tpu.core_type = #tpu.core_type<tc>} {
    %c0 = arith.constant 0 : index
    %c0_0 = arith.constant 0 : index
    %0 = vector.load %arg0[%c0, %c0_0] : memref<8x128xi32, #tpu.memory_space<vmem>>, vector<8x128xi32>
    %c1_i32 = arith.constant 1 : i32
    %1 = tpu.dynamic_rotate %0 by %c1_i32 dim 1 : vector<8x128xi32>, i32 -> vector<8x128xi32>
    %c0_1 = arith.constant 0 : index
    %c0_2 = arith.constant 0 : index
    %2 = vector.load %arg1[%c0_1, %c0_2] : memref<8x128xi32, #tpu.memory_space<vmem>>, vector<8x128xi32>
    tpu.vector_store %arg1[%c0_1, %c0_2], %1 {strides = array<i32>} : memref<8x128xi32, #tpu.memory_space<vmem>>, vector<8x128xi32>,
    return
  }
}

</mosaic_0001>

<bundles_post_ra>
// kernel: tpu_custom_call.1
= control target key start
LH: loop header
LB: loop body
LE: loop exit
PB: predicated region body
PF: predicated region fallthrough
CT: control target
= control target key end

     0   :  { %6 = vsyncpa [#allocation3], 0  ;;  %s128_s0 = inlined_call_operand.hbm [shape: s32[8,128], index: 0, kind: input, shape index: {}]   ;;  %s129_s1 = inlined_call_operand.hbm [shape: s32[8,128], index: 1, kind: output, shape index: {}]  }
   0x1   :  { %7 = vsyncpa [#allocation4], 0  ;;  %s91_s6 = smov [#allocation2]   ;;  %s43_s10 = scalar_lea.hbm %s128_s0, 128 }
   0x2   :  { %s14_s7 = sshll.u32 %s91_s6, 4  ;;  %p44_p0 = scmp.ne.s32.totalorder %s128_s0, %s43_s10  ;;  %s15_s7 = int_to_ptr.vmem [resolvable:$true] %s14_s7 }
   0x3   :  { %p47_p1 = scmp.lt.u32.totalorder %s43_s10, %s128_s0 }
   0x5   :  { %p49_p2 = pnand %p47_p1, %p44_p0 }
   0x7   :  { %52 = shalt.err (!%p49_p2)
}
   0x8   :  { %s53_s15 = scalar_lea.vmem %s15_s7, 128  ;;  %p58_p4 = scmp.lt.s32.totalorder %s15_s7, %s15_s7 }
   0x9   :  { %p54_p3 = scmp.ne.s32.totalorder %s15_s7, %s53_s15  ;;  %p59_p5 = scmp.lt.s32.totalorder %s53_s15, %s53_s15 }
   0xb   :  { %p60_p6 = por %p59_p5, %p58_p4 }
   0xd   :  { %p61_p7 = pnand %p60_p6, %p54_p3 }
   0xf   :  { %64 = shalt.err (!%p61_p7)
}
  0x10   :  { %17 = dma.hbm_to_vmem [thread:$0]  %s128_s0, 128, %s15_s7, [#allocation3]  }
  0x11   :  { %87 = dma.done.wait [#allocation3], 128  }
  0x12   :  { %88 = vsyncadd [#allocation3], 4294967168  ;;  %v21_v0 = vld [vmem:[#allocation2] sm:$0xff]  ;;  %s92_s18 = smov 1   ;;  %s93_s19 = smov [#allocation5]  }
  0x13   :  { %22 = vrot.lane.b32.xlu0 %v21_v0, %s92_s18  ;;  %s31_s20 = sshll.u32 %s93_s19, 4  ;;  %s32_s20 = int_to_ptr.vmem [resolvable:$true] %s31_s20 }
  0x14   :  { %s65_s21 = scalar_lea.vmem %s32_s20, 128  ;;  %p70_p9 = scmp.lt.s32.totalorder %s32_s20, %s32_s20 }
  0x15   :  { %p66_p8 = scmp.ne.s32.totalorder %s32_s20, %s65_s21  ;;  %p71_p10 = scmp.lt.s32.totalorder %s65_s21, %s65_s21 }
  0x17   :  { %p72_p11 = por %p71_p10, %p70_p9 }
  0x19   :  { %p73_p12 = pnand %p72_p11, %p66_p8 }
  0x85   :  { %v23_v1 = vpop.permute.xlu0 %22 }
  0x86   :  { %24 = vst [vmem:[#allocation5] sm:$0xff] %v23_v1 }
  0x87   :  { %76 = shalt.err (!%p73_p12)
}
  0x88   :  { %s77_s0 = scalar_lea.hbm %s129_s1, 128 }
  0x89   :  { %p78_p13 = scmp.ne.s32.totalorder %s129_s1, %s77_s0  ;;  %p81_p0 = scmp.lt.u32.totalorder %s77_s0, %s129_s1 }
  0x8b   :  { %p83_p1 = pnand %p81_p0, %p78_p13 }
  0x8d   :  { %86 = shalt.err (!%p83_p1)
}
  0x8e   :  { %34 = dma.vmem_to_hbm [thread:$0]  %s32_s20, 128, %s129_s1, [#allocation4]  }
  0x8f   :  { %89 = dma.done.wait [#allocation4], 128  }
  0x90   :  { %90 = vsyncadd [#allocation4], 4294967168 }
  0x91   :  { %38 = vsyncpa [#allocation3], 1 }
  0x92   :  { %39 = vsyncpa [#allocation4], 1 }

</bundles_post_ra>
